<compile_context>
chip_gen: v6e
topology: v6e:2x2x1
jax: 0.10.0
libtpu: 0.0.40
codegen_flags: <defaults>
</compile_context>

<pallas_src>
import jax
import jax.numpy as jnp
from jax.experimental import pallas as pl
from jax.experimental.pallas import tpu as pltpu


def _round_up(x: int, m: int) -> int:
    return (x + m - 1) // m * m


# ----------------------------------------------------------------------------
# FiLM:  out = (1 + gamma) * feat + beta     (feat: B,C,H,W; gamma/beta: B,C)
# ----------------------------------------------------------------------------
def _film_kernel(scale_ref, bias_ref, feat_ref, out_ref):
    # scale/bias: (tr, 1) f32; feat/out: (tr, tl).
    x = feat_ref[...].astype(jnp.float32)
    out_ref[...] = (scale_ref[...] * x + bias_ref[...]).astype(out_ref.dtype)


def film_apply(feat, gamma, beta, *, vmem_limit_bytes=32 * 1024 * 1024):
    """feat: (B, C, H, W); gamma/beta: (B, C).  Returns (1+gamma)*feat + beta."""
    B, C, H, W = feat.shape
    R, HW = B * C, H * W
    dtype = feat.dtype
    itemsize = jnp.dtype(dtype).itemsize

    # Lane-dense flattened layout: rows = B*C (sublanes), lanes = H*W.
    feat2 = feat.reshape(R, HW)
    scale = (1.0 + gamma.astype(jnp.float32)).reshape(R, 1)  # affine params stay f32
    bias = beta.astype(jnp.float32).reshape(R, 1)

    # FiLM is pure HBM-bandwidth bound: use the largest lane-dense block that
    # keeps (feat in + out) x 2 pipeline buffers inside the scoped VMEM budget.
    block_budget = vmem_limit_bytes // 8
    hw_aligned = _round_up(HW, 128)
    if 8 * hw_aligned * itemsize <= block_budget:
        tl = hw_aligned                                   # full spatial extent in lanes
        tr = (block_budget // (tl * itemsize)) // 8 * 8   # as many 8-row groups as fit
        tr = max(8, min(tr, _round_up(R, 8)))
    else:
        tl = max(128, (block_budget // (8 * itemsize)) // 128 * 128)
        tr = 8
    Rp = _round_up(R, tr)
    HWp = _round_up(hw_aligned, tl)

    if Rp != R or HWp != HW:
        feat2 = jnp.pad(feat2, ((0, Rp - R), (0, HWp - HW)))
    if Rp != R:
        scale = jnp.pad(scale, ((0, Rp - R), (0, 0)))
        bias = jnp.pad(bias, ((0, Rp - R), (0, 0)))

    grid = (Rp // tr, HWp // tl)
    out = pl.pallas_call(
        _film_kernel,
        out_shape=jax.ShapeDtypeStruct((Rp, HWp), dtype),
        grid=grid,
        in_specs=[
            pl.BlockSpec((tr, 1), lambda i, j: (i, 0)),    # scale rows
            pl.BlockSpec((tr, 1), lambda i, j: (i, 0)),    # bias rows
            pl.BlockSpec((tr, tl), lambda i, j: (i, j)),   # feat tile
        ],
        out_specs=pl.BlockSpec((tr, tl), lambda i, j: (i, j)),
        compiler_params=pltpu.CompilerParams(
            dimension_semantics=("parallel", "parallel"),
            vmem_limit_bytes=vmem_limit_bytes,
        ),
    )(scale, bias, feat2)

    if Rp != R or HWp != HW:
        out = out[:R, :HW]
    return out.reshape(B, C, H, W)


# ----------------------------------------------------------------------------
# Single-query attention over instruction tokens, with the instruction
# projection fused into the kernel.  (The torch code divides by d_k, NOT
# sqrt(d_k) — kept intentionally.)
# ----------------------------------------------------------------------------
def _ctx_attn_kernel(q_ref, instr_ref, w_ref, b_ref, ctx_ref):
    # q_ref/ctx_ref: (1, 1, D2); instr_ref: (1, L, S); w_ref: (S, D2); b_ref: (1, D2)
    q = q_ref[0].astype(jnp.float32)                 # (1, D2)
    instr = instr_ref[0].astype(jnp.float32)         # (L, S)
    w = w_ref[...].astype(jnp.float32)               # (S, D2)
    b = b_ref[...].astype(jnp.float32)               # (1, D2)

    # Fused projection on the MXU (the only matmul-worthy work in this module).
    k = jnp.dot(instr, w, preferred_element_type=jnp.float32) + b      # (L, D2) == K == V
    dk = k.shape[-1]

    # q @ K^T on the MXU (contract D2 of both operands, no materialized transpose).
    qk = jax.lax.dot_general(q, k, (((1,), (1,)), ((), ())),
                             preferred_element_type=jnp.float32) / dk  # (1, L)
    m = jnp.max(qk, axis=-1, keepdims=True)
    e = jnp.exp(qk - m)
    p = e / jnp.sum(e, axis=-1, keepdims=True)
    ctx = jnp.dot(p, k, preferred_element_type=jnp.float32)            # (1, D2)
    ctx_ref[0] = ctx.astype(ctx_ref.dtype)


def ctx_attention_fused(context, instruction, w_instr, b_instr):
    """context: (B, 2P) query; instruction: (B, L, S) raw tokens;
    w_instr: (S, 2P), b_instr: (2P,).  proj_instr is fused into the kernel."""
    B, D2 = context.shape
    _, L, S = instruction.shape
    q3 = context.reshape(B, 1, D2)
    b2 = b_instr.reshape(1, D2)
    out = pl.pallas_call(
        _ctx_attn_kernel,
        out_shape=jax.ShapeDtypeStruct((B, 1, D2), context.dtype),
        grid=(B,),
        in_specs=[
            pl.BlockSpec((1, 1, D2), lambda i: (i, 0, 0)),   # query
            pl.BlockSpec((1, L, S), lambda i: (i, 0, 0)),    # raw instruction tokens
            pl.BlockSpec((S, D2), lambda i: (0, 0)),         # proj weight (replicated)
            pl.BlockSpec((1, D2), lambda i: (0, 0)),         # proj bias   (replicated)
        ],
        out_specs=pl.BlockSpec((1, 1, D2), lambda i: (i, 0, 0)),
        compiler_params=pltpu.CompilerParams(
            dimension_semantics=("parallel",)),
    )(q3, instruction, w_instr, b2)
    return out.reshape(B, D2)


# ----------------------------------------------------------------------------
# FiLM module (parameter setup / embedding lookups are glue in plain JAX)
# ----------------------------------------------------------------------------
class FiLMModuleJax:
    def __init__(self, max_steps, max_cams, mlp, instruction, num_params, instr_size=768):
        self._max_steps = max_steps
        self._max_cams = max_cams
        self._mlp = mlp
        self._instruction = instruction
        self.num_params = num_params
        self._instr_size = instr_size
        self.gamma = None
        self.beta = None
        self.counter = 0
        self._is_built = False

    def build(self, key):
        P = self.num_params
        ks = jax.random.split(key, 6)

        def kaiming_u(k, shape, fan_in):
            bound = (6.0 / fan_in) ** 0.5
            return jax.random.uniform(k, shape, jnp.float32, -bound, bound)

        if self._mlp:
            # nn.Embedding(., P) -> ReLU -> nn.Linear(P, 2P)
            self.emb_cams = kaiming_u(ks[0], (self._max_cams, P), P)
            self.emb_step = kaiming_u(ks[1], (self._max_steps, P), P)
            self.w_cams = kaiming_u(ks[2], (P, 2 * P), P)
            self.b_cams = jnp.zeros((2 * P,), jnp.float32)
            self.w_step = kaiming_u(ks[3], (P, 2 * P), P)
            self.b_step = jnp.zeros((2 * P,), jnp.float32)
        else:
            self.emb_cams = kaiming_u(ks[0], (self._max_cams, 2 * P), 2 * P)
            self.emb_step = kaiming_u(ks[1], (self._max_steps, 2 * P), 2 * P)
        if self._instruction:
            self.w_instr = kaiming_u(ks[4], (self._instr_size, 2 * P), self._instr_size)
            self.b_instr = kaiming_u(ks[5], (2 * P,), self._instr_size)
        self._is_built = True

    def generate_params(self, step_ids, cam_ids, instruction=None):
        if not self._is_built:
            self.build(jax.random.PRNGKey(0))
        self.counter = 0
        # Embedding lookups / tiny per-id MLPs stay in plain JAX (parameter-setup
        # glue; a pallas_call launch would cost more than the math).
        if self._mlp:
            c = jax.nn.relu(self.emb_cams[cam_ids]) @ self.w_cams + self.b_cams
            s = jax.nn.relu(self.emb_step[step_ids]) @ self.w_step + self.b_step
            context = c + s
        else:
            context = self.emb_cams[cam_ids] + self.emb_step[step_ids]
        if instruction is not None and self._instruction:
            # Pallas kernel: proj_instr fused with single-query attention.
            context = ctx_attention_fused(context, instruction, self.w_instr, self.b_instr)
        P = self.num_params
        self.gamma = context[:, :P]
        self.beta = context[:, P:]
        return self.gamma, self.beta

    def forward(self, feat):
        # TODO(synk): self.counter is Python-side state (matches the torch module);
        # not jit/trace-safe if this object is captured inside jax.jit.
        nc = feat.shape[1]
        if self.gamma is None or self.beta is None:
            raise RuntimeError("Use generate_params before forward")
        g = self.gamma[:, self.counter:self.counter + nc]
        b = self.beta[:, self.counter:self.counter + nc]
        self.counter += nc
        return film_apply(feat, g, b)


# ----------------------------------------------------------------------------
if __name__ == "__main__":
    # Full-f32 matmuls everywhere so the Pallas MXU path and the XLA reference
    # path agree numerically.
    jax.config.update("jax_default_matmul_precision", "highest")

    key = jax.random.PRNGKey(0)
    k_feat, k_instr, k_build = jax.random.split(key, 3)

    B, C, H, W = 2, 4, 16, 16
    L, instr_size = 8, 64
    max_steps, max_cams = 10, 3

    mod = FiLMModuleJax(max_steps, max_cams, mlp=True, instruction=True,
                        num_params=C, instr_size=instr_size)
    mod.build(k_build)

    feat = jax.random.normal(k_feat, (B, C, H, W), jnp.float32)
    instruction = jax.random.normal(k_instr, (B, L, instr_size), jnp.float32)
    step_ids = jnp.array([1, 3], jnp.int32)
    cam_ids = jnp.array([0, 2], jnp.int32)

    gamma, beta = mod.generate_params(step_ids, cam_ids, instruction)
    out = mod.forward(feat)
    out = jax.block_until_ready(out)

    # pure-JAX reference of the full generate_params + forward path
    c = jax.nn.relu(mod.emb_cams[cam_ids]) @ mod.w_cams + mod.b_cams
    s = jax.nn.relu(mod.emb_step[step_ids]) @ mod.w_step + mod.b_step
    ctx = c + s
    Kp = instruction @ mod.w_instr + mod.b_instr
    dk = Kp.shape[-1]
    qk = jnp.einsum('bd,bld->bl', ctx, Kp) / dk
    p = jax.nn.softmax(qk, axis=-1)
    ctx = jnp.einsum('bl,bld->bd', p, Kp)
    g_ref, b_ref = ctx[:, :C], ctx[:, C:]
    ref = (1.0 + g_ref[:, :, None, None]) * feat + b_ref[:, :, None, None]

    assert jnp.allclose(out, ref, atol=1e-3, rtol=1e-3), "mismatch vs reference"
    print("KERNEL_OK")
</pallas_src>

<mosaic_0001>
module attributes {stable_mosaic.version = 11 : i64} {
  func.func @_ctx_attn_kernel(%arg0: i32, %arg1: memref<1x1x8xf32, #tpu.memory_space<vmem>>, %arg2: memref<1x8x64xf32, #tpu.memory_space<vmem>>, %arg3: memref<64x8xf32, #tpu.memory_space<vmem>>, %arg4: memref<1x8xf32, #tpu.memory_space<vmem>>, %arg5: memref<1x1x8xf32, #tpu.memory_space<vmem>>) attributes {dimension_semantics = [#tpu.dimension_semantics<parallel>], iteration_bounds = array<i64: 2>, scalar_prefetch = 0 : i64, scratch_operands = 0 : i64, tpu.core_type = #tpu.core_type<tc>, window_params = [{transform_indices = @transform_0, window_bounds = array<i64: 1, 1, 8>}, {transform_indices = @transform_1, window_bounds = array<i64: 1, 8, 64>}, {pipeline_mode = #tpu.pipeline_mode<synchronous>, transform_indices = @transform_2, window_bounds = array<i64: 64, 8>}, {pipeline_mode = #tpu.pipeline_mode<synchronous>, transform_indices = @transform_3, window_bounds = array<i64: 1, 8>}, {transform_indices = @transform_4, window_bounds = array<i64: 1, 1, 8>}]} {
    %c0 = arith.constant 0 : index
    %c0_0 = arith.constant 0 : index
    %c0_1 = arith.constant 0 : index
    %0 = vector.load %arg1[%c0, %c0_0, %c0_1] : memref<1x1x8xf32, #tpu.memory_space<vmem>>, vector<1x1x8xf32>
    %1 = vector.shape_cast %0 : vector<1x1x8xf32> to vector<1x8xf32>
    %c0_2 = arith.constant 0 : index
    %c0_3 = arith.constant 0 : index
    %c0_4 = arith.constant 0 : index
    %2 = vector.load %arg2[%c0_2, %c0_3, %c0_4] : memref<1x8x64xf32, #tpu.memory_space<vmem>>, vector<1x8x64xf32>
    %3 = vector.shape_cast %2 : vector<1x8x64xf32> to vector<8x64xf32>
    %c0_5 = arith.constant 0 : index
    %c0_6 = arith.constant 0 : index
    %4 = vector.load %arg3[%c0_5, %c0_6] : memref<64x8xf32, #tpu.memory_space<vmem>>, vector<64x8xf32>
    %c0_7 = arith.constant 0 : index
    %c0_8 = arith.constant 0 : index
    %5 = vector.load %arg4[%c0_7, %c0_8] : memref<1x8xf32, #tpu.memory_space<vmem>>, vector<1x8xf32>
    %cst = arith.constant dense<0.000000e+00> : vector<8x8xf32>
    %6 = tpu.matmul %3, %4, %cst {dimension_numbers = #tpu.dot_dimension_numbers<[1], [0], [0], [1], [0, 0, 1, 1], [], []>, precision = #tpu.contract_precision<fp32>} : vector<8x64xf32>, vector<64x8xf32>, vector<8x8xf32> -> vector<8x8xf32>
    %7 = vector.broadcast %5 : vector<1x8xf32> to vector<8x8xf32>
    %8 = arith.addf %6, %7 : vector<8x8xf32>
    %cst_9 = arith.constant dense<0.000000e+00> : vector<1x8xf32>
    %9 = tpu.matmul %1, %8, %cst_9 {dimension_numbers = #tpu.dot_dimension_numbers<[1], [1], [0], [0], [0, 0, 1, 0], [], []>, precision = #tpu.contract_precision<fp32>} : vector<1x8xf32>, vector<8x8xf32>, vector<1x8xf32> -> vector<1x8xf32>
    %cst_10 = arith.constant 8.000000e+00 : f32
    %10 = vector.broadcast %cst_10 : f32 to vector<1x8xf32>
    %11 = arith.divf %9, %10 : vector<1x8xf32>
    %cst_11 = arith.constant dense<0xFF800000> : vector<1xf32>
    %12 = vector.multi_reduction <maximumf>, %11, %cst_11 [1] : vector<1x8xf32> to vector<1xf32>
    %13 = vector.shape_cast %12 : vector<1xf32> to vector<1x1xf32>
    %14 = vector.broadcast %13 : vector<1x1xf32> to vector<1x8xf32>
    %15 = arith.subf %11, %14 : vector<1x8xf32>
    %16 = math.exp %15 : vector<1x8xf32>
    %cst_12 = arith.constant dense<0.000000e+00> : vector<1xf32>
    %17 = vector.multi_reduction <add>, %16, %cst_12 [1] : vector<1x8xf32> to vector<1xf32>
    %18 = vector.shape_cast %17 : vector<1xf32> to vector<1x1xf32>
    %19 = vector.broadcast %18 : vector<1x1xf32> to vector<1x8xf32>
    %20 = arith.divf %16, %19 : vector<1x8xf32>
    %cst_13 = arith.constant dense<0.000000e+00> : vector<1x8xf32>
    %21 = tpu.matmul %20, %8, %cst_13 {dimension_numbers = #tpu.dot_dimension_numbers<[1], [0], [0], [1], [0, 0, 1, 1], [], []>, precision = #tpu.contract_precision<fp32>} : vector<1x8xf32>, vector<8x8xf32>, vector<1x8xf32> -> vector<1x8xf32>
    %c0_14 = arith.constant 0 : index
    %c0_15 = arith.constant 0 : index
    %c0_16 = arith.constant 0 : index
    %22 = vector.load %arg5[%c0_14, %c0_15, %c0_16] : memref<1x1x8xf32, #tpu.memory_space<vmem>>, vector<1x1x8xf32>
    %23 = vector.shape_cast %22 : vector<1x1x8xf32> to vector<1x8xf32>
    %24 = vector.shape_cast %21 : vector<1x8xf32> to vector<1x1x8xf32>
    tpu.vector_store %arg5[%c0_14, %c0_15, %c0_16], %24 {strides = array<i32>} : memref<1x1x8xf32, #tpu.memory_space<vmem>>, vector<1x1x8xf32>,
    return
  }
  func.func @transform_0(%arg0: i32) -> (i32, i32, i32) {
    %c0_i32 = arith.constant 0 : i32
    %c0_i32_0 = arith.constant 0 : i32
    %c0_i32_1 = arith.constant 0 : i32
    return %arg0, %c0_i32, %c0_i32_0 : i32, i32, i32
  }
  func.func @transform_1(%arg0: i32) -> (i32, i32, i32) {
    %c0_i32 = arith.constant 0 : i32
    %c0_i32_0 = arith.constant 0 : i32
    %c0_i32_1 = arith.constant 0 : i32
    return %arg0, %c0_i32, %c0_i32_0 : i32, i32, i32
  }
  func.func @transform_2(%arg0: i32) -> (i32, i32) {
    %c0_i32 = arith.constant 0 : i32
    %c0_i32_0 = arith.constant 0 : i32
    %c0_i32_1 = arith.constant 0 : i32
    return %c0_i32, %c0_i32_0 : i32, i32
  }
  func.func @transform_3(%arg0: i32) -> (i32, i32) {
    %c0_i32 = arith.constant 0 : i32
    %c0_i32_0 = arith.constant 0 : i32
    %c0_i32_1 = arith.constant 0 : i32
    return %c0_i32, %c0_i32_0 : i32, i32
  }
  func.func @transform_4(%arg0: i32) -> (i32, i32, i32) {
    %c0_i32 = arith.constant 0 : i32
    %c0_i32_0 = arith.constant 0 : i32
    %c0_i32_1 = arith.constant 0 : i32
    return %arg0, %c0_i32, %c0_i32_0 : i32, i32, i32
  }
}

</mosaic_0001>

<bundles_post_ra>
// kernel: tpu_custom_call.1
= control target key start
LH: loop header
LB: loop body
LE: loop exit
PB: predicated region body
PF: predicated region fallthrough
CT: control target
= control target key end

     0   :  { %9 = vsyncpa [#allocation3], 0  ;;  %s2530_s0 = inlined_call_operand.vmem [shape: f32[2,1,8], index: 0, kind: input, shape index: {}]   ;;  %s2531_s1 = inlined_call_operand.vmem [shape: f32[2,8,64], index: 1, kind: input, shape index: {}]   ;;  %s2532_s2 = inlined_call_operand.vmem [shape: f32[64,8], index: 2, kind: input, shape index: {}]   ;;  %s2533_s3 = inlined_call_operand.vmem [shape: f32[1,8], index: 3, kind: input, shape index: {}]   ;;  %s2534_s4 = inlined_call_operand.hbm [shape: f32[2,1,8], index: 4, kind: output, shape index: {}]  }
   0x1   :  { %11 = vsyncpa [#allocation3 + $0x1], 0  ;;  %s2154_s15 = smov 0   ;;  %s2156_s16 = smov 0  }
   0x2   :  { %s2158_s17 = smov 0   ;;  %s2160_s18 = smov 0  }
   0x3 LB: > { %s2175_s19 = sadd.s32 4294967295, %s2124_s18   ;;  %s1758_s20 = sadd.s32 4294967294, %s2124_s18   ;;  %s2124_s18 = sphi %s2160_s18, %s2540_s18   ;;  %s2120_s17 = sphi %s2158_s17, %s2539_s17   ;;  %s2116_s16 = sphi %s2156_s16, %s2538_s16   ;;  %s2112_s15 = sphi %s2154_s15, %s2537_s15  }
   0x4   : > { %s2179_s21 = sadd.s32 1, %s2124_s18   ;;  %s118_s22 = sadd.s32 1, %s2120_s17 }
   0x5   : > { %s115_s23 = ssub.s32 %s2124_s18, %s2179_s21  ;;  %p128_p0 = scmp.ne.s32.totalorder %s2120_s17, %s2116_s16 }
   0x6   : > { %p116_p1 = scmp.eq.s32.totalorder %s115_s23, 0  ;;  %p129_p2 = scmp.eq.s32.totalorder %s2175_s19, 1 }
   0x7   : > { %p134_p3 = scmp.ne.s32.totalorder %s2116_s16, %s2112_s15  ;;  %p135_p4 = scmp.eq.s32.totalorder %s1758_s20, 1 }
   0x8   : > { %s2190_s24 = scalar_select %p116_p1, %s2120_s17, %s118_s22  }
   0x9   : > { %p2192_p5 = por %p129_p2, %p128_p0  ;;  %p2196_p6 = por %p135_p4, %p134_p3 }
   0xa   : > { %p1761_p7 = scmp.ge.s32.totalorder %s2124_s18, 1  ;;  %p172_p8 = scmp.lt.s32.totalorder %s2124_s18, 3 }
   0xc   : > { %p173_p9 = pnand %p1761_p7, %p172_p8 }
   0xd   : > { %p199_p10 = scmp.lt.s32.totalorder (!%p173_p9), %s2175_s19, 1  ;;  %s197_s10 = sand.u32 (!%p173_p9), 1, %s2116_s16  }
   0xe   : > { %176 = sbr.rel (%p173_p9) target bundleno = 1036 (0x40c), region = 36  ;;  %s1764_s11 = sshll.u32 (!%p173_p9), %s2175_s19, 4 }
   0xf   : > { %s198_s12 = scalar_lea.vmem (!%p173_p9), [#allocation2], %s197_s10  ;;  %s1692_s22 = scalar_lea.hbm (!%p173_p9), %s2534_s4, %s1764_s11 }
  0x10   : > { %s1694_s13 = sshll.u32 (!%p173_p9), %s198_s12, 4  ;;  %s2128_s28 = smov (!%p173_p9), [#allocation2]   ;;  %s1695_s13 = int_to_ptr.vmem [resolvable:$true] %s1694_s13 }
  0x13   : > { %v215_v0 = vld [vmem:[%s2532_s2 + $0x38] sm:$0xff]  ;;  %v214_v1 = vld [vmem:[%s2532_s2 + $0x30] sm:$0xff]  ;;  %v213_v2 = vld [vmem:[%s2532_s2 + $0x28] sm:$0xff]  ;;  %v2126_v3 = vmov 0.0   ;;  %vm2127_vm0 = vmmov 0   ;;  %s2246_s23 = scalar_select %p199_p10, %s2175_s19, 1 }
  0x14   : > { %1845 = vmatprep.subr.mxu0 %v2126_v3  ;;  %v2213_v4 = vand.u32 4294901760, %v215_v0  ;;  %v2215_v5 = vand.u32 4294901760, %v214_v1  ;;  %v2217_v6 = vand.u32 4294901760, %v213_v2  ;;  %v212_v7 = vld [vmem:[%s2532_s2 + $0x20] sm:$0xff]  ;;  %1864 = vmatprep.subr.mxu1 %v2126_v3  ;;  %v211_v8 = vld [vmem:[%s2532_s2 + $0x18] sm:$0xff]  ;;  %v210_v9 = vld [vmem:[%s2532_s2 + $0x10] sm:$0xff] }
  0x15   : > { %v2229_v10 = vand.u32 4294901760, %v212_v7  ;;  %v2231_v11 = vand.u32 4294901760, %v211_v8  ;;  %v2233_v12 = vand.u32 4294901760, %v210_v9  ;;  %v209_v13 = vld [vmem:[%s2532_s2 + $0x8] sm:$0xff]  ;;  %v208_v14 = vld [vmem:[%s2532_s2] sm:$0xff]  ;;  %1861 = vmatprep.mubr.msk.f32.mxu0 %vm2127_vm0, %v2126_v3  ;;  %1880 = vmatprep.mubr.msk.f32.mxu1 %vm2127_vm0, %v2126_v3  ;;  %s1762_s27 = sshll.u32 %s2246_s23, 3  ;;  %s201_s7 = scalar_lea.vmem %s2530_s0, %s2246_s23 }
  0x16   : > { %1846 = vmatpush3.msra.mxu0 %v2213_v4  ;;  %v2252_v15 = vsub.f32 %v215_v0, %v2213_v4  ;;  %v2255_v16 = vsub.f32 %v214_v1, %v2215_v5  ;;  %v2257_v17 = vand.u32 4294901760, %v209_v13  ;;  %v2260_v18 = vsub.f32 %v213_v2, %v2217_v6  ;;  %s205_s30 = scalar_lea.vmem %s2531_s1, %s1762_s27  ;;  %v206_v63 = vld [vmem:[%s201_s7] sm:$0x1]  ;;  %s1682_s23 = scalar_lea.sflag [#allocation3], %s197_s10 }
  0x17   : > { %1847 = vmatprep.subr.mxu0 %v2126_v3  ;;  %v2263_v19 = vand.u32 4294901760, %v208_v14  ;;  %v2266_v20 = vsub.f32 %v212_v7, %v2229_v10  ;;  %vm223_vm1 = vcmask 523264   ;;  %v2270_v21 = vsub.f32 %v211_v8, %v2231_v11  ;;  %v207_v27 = vld [vmem:[%s205_s30] sm:$0xff]  ;;  %s2064_s27 = scalar_lea.vmem %s1695_s13, 16  ;;  %s2068_s19 = sshll.u32 %s2128_s28, 4  ;;  %s2069_s19 = int_to_ptr.vmem [resolvable:$false] %s2068_s19 }
  0x18   : > { %1848 = vmatpush3.msra.mxu0 %v2215_v5  ;;  %v329_v22 = vand.u32 4294901760, %v2252_v15  ;;  %v336_v23 = vand.u32 4294901760, %v2255_v16  ;;  %v343_v24 = vand.u32 4294901760, %v2260_v18  ;;  %v2280_v25 = vsub.f32 %v210_v9, %v2233_v12  ;;  %v1763_v1 = vld [vmem:[%s2533_s3] ss:$0 sm:$0xff]  ;;  %p2065_p11 = scmp.ne.s32.totalorder %s1695_s13, %s2064_s27  ;;  %s2070_s29 = scalar_lea.vmem %s2069_s19, 32 }
  0x19   : > { %1849 = vmatprep.subr.mxu0 %v2126_v3  ;;  %v350_v26 = vand.u32 4294901760, %v2266_v20  ;;  %v357_v28 = vand.u32 4294901760, %v2270_v21  ;;  %v2286_v29 = vsub.f32 %v209_v13, %v2257_v17  ;;  %v225_v33 = vsel %vm223_vm1, %v207_v27, 0  ;;  %p2071_p0 = scmp.lt.s32.totalorder %s1695_s13, %s2069_s19  ;;  %p2072_p1 = scmp.lt.s32.totalorder %s2070_s29, %s2064_s27 }
  0x1a   : > { %1850 = vmatpush3.msra.mxu0 %v2217_v6  ;;  %v330_v30 = vsub.f32 %v2252_v15, %v329_v22  ;;  %v337_v31 = vsub.f32 %v2255_v16, %v336_v23  ;;  %v344_v32 = vsub.f32 %v2260_v18, %v343_v24  ;;  %v2300_v34 = vand.u32 4294901760, %v225_v33  ;;  %p2066_p12 = pnand %p2065_p11, %p2192_p5 }
  0x1b   : > { %1851 = vmatprep.subr.mxu0 %v2126_v3  ;;  %v2303_v35 = vsub.f32 %v208_v14, %v2263_v19  ;;  %v351_v38 = vsub.f32 %v2266_v20, %v350_v26  ;;  %v364_v39 = vand.u32 4294901760, %v2280_v25  ;;  %v358_v42 = vsub.f32 %v2270_v21, %v357_v28  ;;  %p2073_p2 = por %p2072_p1, %p2071_p0 }
  0x1c   : > { %1852 = vmatpush3.msra.mxu0 %v2229_v10  ;;  %v331_v36 = vand.u32 4294901760, %v330_v30  ;;  %v338_v37 = vand.u32 4294901760, %v337_v31  ;;  %v2312_v40 = vsub.f32 %v225_v33, %v2300_v34  ;;  %v345_v41 = vand.u32 4294901760, %v344_v32  ;;  %p2067_p13 = pneg %p2066_p12 }
  0x1d   : > { %1853 = vmatprep.subr.mxu0 %v2126_v3  ;;  %v371_v43 = vand.u32 4294901760, %v2286_v29  ;;  %v352_v45 = vand.u32 4294901760, %v351_v38  ;;  %v365_v46 = vsub.f32 %v2280_v25, %v364_v39  ;;  %v378_v47 = vand.u32 4294901760, %v2303_v35 }
  0x1e   : > { %1854 = vmatpush3.msra.mxu0 %v2231_v11  ;;  %1865 = vmatpush3.msra.mxu1 %v331_v36  ;;  %v302_v44 = vand.u32 4294901760, %v2312_v40  ;;  %v359_v49 = vand.u32 4294901760, %v358_v42  ;;  %vm764_vm2 = vcmask 64512   ;;  %vm1219_vm3 = vcmask 57344   ;;  %p2074_p3 = pnand %p2073_p2, %p2067_p13 }
  0x1f   : > { %1855 = vmatprep.subr.mxu0 %v2126_v3  ;;  %1866 = vmatprep.subr.mxu1 %v2126_v3  ;;  %v372_v50 = vsub.f32 %v2286_v29, %v371_v43  ;;  %v366_v52 = vand.u32 4294901760, %v365_v46  ;;  %v379_v53 = vsub.f32 %v2303_v35, %v378_v47  ;;  %v766_v2 = vsel %vm764_vm2, %v206_v63, 0 }
  0x20   : > { %1856 = vmatpush3.msra.mxu0 %v2233_v12  ;;  %1867 = vmatpush3.msra.mxu1 %v338_v37  ;;  %v303_v48 = vsub.f32 %v2312_v40, %v302_v44 }
  0x21   : > { %1857 = vmatprep.subr.mxu0 %v2126_v3  ;;  %1868 = vmatprep.subr.mxu1 %v2126_v3  ;;  %v373_v54 = vand.u32 4294901760, %v372_v50  ;;  %v380_v55 = vand.u32 4294901760, %v379_v53 }
  0x22   : > { %1858 = vmatpush3.msra.mxu0 %v2257_v17  ;;  %1869 = vmatpush3.msra.mxu1 %v345_v41  ;;  %v304_v51 = vand.u32 4294901760, %v303_v48 }
  0x23   : > { %1859 = vmatprep.subr.mxu0 %v2126_v3  ;;  %1870 = vmatprep.subr.mxu1 %v2126_v3 }
  0x24   : > { %1860 = vmatpush3.msra.mxu0 %v2263_v19  ;;  %1871 = vmatpush3.msra.mxu1 %v352_v45 }
  0x25   : > { %1872 = vmatprep.subr.mxu1 %v2126_v3  ;;  %1883 = vmatprep.subr.mxu0 %v2126_v3 }
  0x26   : > { %1862 = vmatmul.mubr.f32.vlgmr.msra.gmra.mxu0 %v304_v51  ;;  %1873 = vmatpush3.msra.mxu1 %v359_v49 }
  0x27   : > { %1884 = vmatpush3.msra.mxu0 %v2252_v15  ;;  %1874 = vmatprep.subr.mxu1 %v2126_v3 }
  0x28   : > { %1885 = vmatprep.subr.mxu0 %v2126_v3  ;;  %1875 = vmatpush3.msra.mxu1 %v366_v52 }
  0x29   : > { %1886 = vmatpush3.msra.mxu0 %v2255_v16  ;;  %1876 = vmatprep.subr.mxu1 %v2126_v3 }
  0x2a   : > { %1887 = vmatprep.subr.mxu0 %v2126_v3  ;;  %1877 = vmatpush3.msra.mxu1 %v373_v54 }
  0x2b   : > { %1888 = vmatpush3.msra.mxu0 %v2260_v18  ;;  %1878 = vmatprep.subr.mxu1 %v2126_v3 }
  0x2c   : > { %1889 = vmatprep.subr.mxu0 %v2126_v3  ;;  %1879 = vmatpush3.msra.mxu1 %v380_v55 }
  0x2d   : > { %1890 = vmatpush3.msra.mxu0 %v2266_v20  ;;  %1881 = vmatmul.mubr.f32.vlgmr.msra.gmra.mxu1 %v2300_v34 }
  0x2e   : > { %1891 = vmatprep.subr.mxu0 %v2126_v3  ;;  %1902 = vmatprep.subr.mxu1 %v2126_v3 }
  0x2f   : > { %1892 = vmatpush3.msra.mxu0 %v2270_v21  ;;  %1903 = vmatpush3.msra.mxu1 %v2213_v4 }
  0x30   : > { %1893 = vmatprep.subr.mxu0 %v2126_v3  ;;  %1904 = vmatprep.subr.mxu1 %v2126_v3 }
  0x31   : > { %1894 = vmatpush3.msra.mxu0 %v2280_v25  ;;  %1905 = vmatpush3.msra.mxu1 %v2215_v5 }
  0x32   : > { %1895 = vmatprep.subr.mxu0 %v2126_v3  ;;  %1906 = vmatprep.subr.mxu1 %v2126_v3 }
  0x33   : > { %1896 = vmatpush3.msra.mxu0 %v2286_v29  ;;  %1907 = vmatpush3.msra.mxu1 %v2217_v6 }
  0x34   : > { %1897 = vmatprep.subr.mxu0 %v2126_v3  ;;  %1908 = vmatprep.subr.mxu1 %v2126_v3 }
  0x35   : > { %1898 = vmatpush3.msra.mxu0 %v2303_v35  ;;  %1899 = vmatprep.mubr.msk.f32.mxu0 %vm2127_vm0, %v2126_v3 }
  0x36   : > { %1909 = vmatpush3.msra.mxu1 %v2229_v10  ;;  %1900 = vmatmul.mubr.f32.vlgmr.msra.gmra.mxu0 %v2312_v40 }
  0x37   : > { %1910 = vmatprep.subr.mxu1 %v2126_v3  ;;  %1921 = vmatprep.subr.mxu0 %v2126_v3 }
  0x38   : > { %1911 = vmatpush3.msra.mxu1 %v2231_v11  ;;  %1922 = vmatpush3.msra.mxu0 %v329_v22 }
  0x39   : > { %1912 = vmatprep.subr.mxu1 %v2126_v3  ;;  %1923 = vmatprep.subr.mxu0 %v2126_v3 }
  0x3a   : > { %1913 = vmatpush3.msra.mxu1 %v2233_v12  ;;  %1924 = vmatpush3.msra.mxu0 %v336_v23 }
  0x3b   : > { %1914 = vmatprep.subr.mxu1 %v2126_v3  ;;  %1925 = vmatprep.subr.mxu0 %v2126_v3 }
  0x3c   : > { %1915 = vmatpush3.msra.mxu1 %v2257_v17  ;;  %1926 = vmatpush3.msra.mxu0 %v343_v24 }
  0x3d   : > { %1916 = vmatprep.subr.mxu1 %v2126_v3  ;;  %1927 = vmatprep.subr.mxu0 %v2126_v3 }
  0x3e   : > { %1917 = vmatpush3.msra.mxu1 %v2263_v19  ;;  %1918 = vmatprep.mubr.msk.f32.mxu1 %vm2127_vm0, %v2126_v3 }
  0x3f   : > { %1928 = vmatpush3.msra.mxu0 %v350_v26  ;;  %1919 = vmatmul.mubr.f32.vlgmr.msra.gmra.mxu1 %v302_v44 }
  0x40   : > { %1929 = vmatprep.subr.mxu0 %v2126_v3  ;;  %1940 = vmatprep.subr.mxu1 %v2126_v3 }
  0x41   : > { %1930 = vmatpush3.msra.mxu0 %v357_v28  ;;  %1941 = vmatpush3.msra.mxu1 %v2213_v4 }
  0x42   : > { %1931 = vmatprep.subr.mxu0 %v2126_v3  ;;  %1942 = vmatprep.subr.mxu1 %v2126_v3 }
  0x43   : > { %1932 = vmatpush3.msra.mxu0 %v364_v39  ;;  %1943 = vmatpush3.msra.mxu1 %v2215_v5  ;;  %v837_v5 = vand.u32 4294901760, %v766_v2 }
  0x44   : > { %1933 = vmatprep.subr.mxu0 %v2126_v3  ;;  %1944 = vmatprep.subr.mxu1 %v2126_v3 }
  0x45   : > { %1934 = vmatpush3.msra.mxu0 %v371_v43  ;;  %1945 = vmatpush3.msra.mxu1 %v2217_v6  ;;  %v838_v9 = vsub.f32 %v766_v2, %v837_v5 }
  0x46   : > { %1935 = vmatprep.subr.mxu0 %v2126_v3  ;;  %1946 = vmatprep.subr.mxu1 %v2126_v3 }
  0x47   : > { %1936 = vmatpush3.msra.mxu0 %v378_v47  ;;  %1937 = vmatprep.mubr.msk.f32.mxu0 %vm2127_vm0, %v2126_v3 }
  0x48   : > { %1947 = vmatpush3.msra.mxu1 %v2229_v10  ;;  %1938 = vmatmul.mubr.f32.vlgmr.msra.gmra.mxu0 %v2300_v34 }
  0x49   : > { %1948 = vmatprep.subr.mxu1 %v2126_v3  ;;  %1956 = vmatprep.mubr.msk.f32.mxu1 %vm2127_vm0, %v2126_v3 }
  0x4a   : > { %1949 = vmatpush3.msra.mxu1 %v2231_v11  ;;  %1959 = vmatprep.subr.mxu0 %v2126_v3 }
  0x4b   : > { %1950 = vmatprep.subr.mxu1 %v2126_v3  ;;  %1961 = vmatprep.mubr.msk.f32.mxu0 %vm2127_vm0, %v2126_v3 }
  0x4c   : > { %1951 = vmatpush3.msra.mxu1 %v2233_v12  ;;  %v839_v12 = vand.u32 4294901760, %v838_v9 }
  0x4d   : > { %1952 = vmatprep.subr.mxu1 %v2126_v3 }
  0x4e   : > { %1953 = vmatpush3.msra.mxu1 %v2257_v17  ;;  %v840_v16 = vsub.f32 %v838_v9, %v839_v12 }
  0x4f   : > { %1954 = vmatprep.subr.mxu1 %v2126_v3 }
  0x50   : > { %1955 = vmatpush3.msra.mxu1 %v2263_v19  ;;  %v841_v20 = vand.u32 4294901760, %v840_v16 }
  0x51   : > { %1957 = vmatmul.mubr.f32.vlgmr.msra.gmra.mxu1 %v2300_v34  ;;  %1964 = vmatprep.subr.mxu1 %v2126_v3 }
  0x52   : > { %1966 = vmatprep.mubr.msk.f32.mxu1 %vm2127_vm0, %v2126_v3 }
  0xe6   : > { %v306_v56 = vpop.f32.mrf.mxu0 }
  0xe7   : > { %v307_v4 = vadd.f32 %v1763_v1, %v306_v56 }
  0xe8   : > { %v1863_v57 = vpop.f32.mrf.mxu0 }
  0xed   : > { %v417_v58 = vpop.f32.mrf.mxu1 }
  0xee   : > { %v418_v7 = vadd.f32 %v417_v58, %v307_v4 }
  0xef   : > { %v1882_v59 = vpop.f32.mrf.mxu1 }
  0xf6   : > { %v505_v60 = vpop.f32.mrf.mxu0 }
  0xf7   : > { %v506_v10 = vadd.f32 %v505_v60, %v418_v7 }
  0xf8   : > { %v1901_v61 = vpop.f32.mrf.mxu0 }
  0xff   : > { %v586_v62 = vpop.f32.mrf.mxu1 }
 0x100   : > { %v587_v11 = vadd.f32 %v586_v62, %v506_v10 }
 0x101   : > { %v1920_v0 = vpop.f32.mrf.mxu1 }
 0x108   : > { %v681_v6 = vpop.f32.mrf.mxu0 }
 0x109   : > { %v682_v13 = vadd.f32 %v681_v6, %v587_v11 }
 0x10a   : > { %v1939_v8 = vpop.f32.mrf.mxu0 }
 0x111   : > { %v760_v14 = vpop.f32.mrf.mxu1 }
 0x112   : > { %v761_v15 = vadd.f32 %v760_v14, %v682_v13 }
 0x113   : > { %v1958_v17 = vpop.f32.mrf.mxu1 }
 0x114   : > { %v769_v18 = vsel %vm764_vm2, %v761_v15, 0  ;;  %v2448_v22 = vand.u32 4294901760, %v761_v15 }
 0x115   : > { %v802_v19 = vand.u32 4294901760, %v769_v18 }
 0x116   : > { %v2454_v25 = vsub.f32 %v761_v15, %v2448_v22 }
 0x117   : > { %v879_v21 = vsub.f32 %v769_v18, %v802_v19  ;;  %1960 = vmatpush3.xpose.msra.mxu0 %v802_v19 }
 0x118   : > { %1969 = vmatprep.subr.mxu0 %v2126_v3  ;;  %v1343_v27 = vand.u32 4294901760, %v2454_v25 }
 0x119   : > { %v880_v23 = vand.u32 4294901760, %v879_v21 }
 0x11a   : > { %1962 = vmatmul.mubr.f32.vlgmr.msra.gmra.mxu0 %v841_v20  ;;  %v1344_v28 = vsub.f32 %v2454_v25, %v1343_v27 }
 0x11b   : > { %1970 = vmatpush3.xpose.msra.mxu0 %v879_v21  ;;  %1971 = vmatprep.mubr.msk.f32.mxu0 %vm2127_vm0, %v2126_v3  ;;  %v881_v24 = vsub.f32 %v879_v21, %v880_v23 }
 0x11c   : > { %1979 = vmatprep.subr.mxu0 %v2126_v3  ;;  %v1345_v29 = vand.u32 4294901760, %v1344_v28 }
 0x11d   : > { %v882_v26 = vand.u32 4294901760, %v881_v24 }
 0x11e   : > { %1972 = vmatmul.mubr.f32.vlgmr.msra.gmra.mxu0 %v838_v9 }
 0x11f   : > { %1965 = vmatpush3.xpose.msra.mxu1 %v882_v26  ;;  %1980 = vmatpush3.xpose.msra.mxu0 %v880_v23 }
 0x120   : > { %1974 = vmatprep.subr.mxu1 %v2126_v3  ;;  %1981 = vmatprep.mubr.msk.f32.mxu0 %vm2127_vm0, %v2126_v3 }
 0x121   : > { %1989 = vmatprep.subr.mxu0 %v2126_v3 }
 0x122   : > { %1967 = vmatmul.mubr.f32.vlgmr.msra.gmra.mxu1 %v837_v5  ;;  %1982 = vmatmul.mubr.f32.vlgmr.msra.gmra.mxu0 %v837_v5 }
 0x123   : > { %1975 = vmatpush3.xpose.msra.mxu1 %v802_v19  ;;  %1990 = vmatpush3.msra.mxu0 %v2448_v22 }
 0x124   : > { %1976 = vmatprep.mubr.msk.f32.mxu1 %vm2127_vm0, %v2126_v3  ;;  %1984 = vmatprep.subr.mxu1 %v2126_v3 }
 0x125   : > { %1991 = vmatprep.mubr.msk.f32.mxu0 %vm2127_vm0, %v2126_v3  ;;  %1999 = vmatprep.subr.mxu0 %v2126_v3 }
 0x126   : > { %1977 = vmatmul.mubr.f32.vlgmr.msra.gmra.mxu1 %v839_v12 }
 0x127   : > { %1985 = vmatpush3.xpose.msra.mxu1 %v802_v19  ;;  %1986 = vmatprep.mubr.msk.f32.mxu1 %vm2127_vm0, %v2126_v3 }
 0x128   : > { %1994 = vmatprep.subr.mxu1 %v2126_v3 }
 0x12a   : > { %1987 = vmatmul.mubr.f32.vlgmr.msra.gmra.mxu1 %v837_v5 }
 0x12b   : > { %1995 = vmatpush3.msra.mxu1 %v1345_v29  ;;  %1996 = vmatprep.mubr.msk.f32.mxu1 %vm2127_vm0, %v2126_v3 }
 0x12c   : > { %2004 = vmatprep.subr.mxu1 %v2126_v3 }
 0x1da   : > { %v843_v30 = vpop.f32.mrf.mxu0 }
 0x1dc   : > { %v1963_v31 = vpop.f32.mrf.mxu0 }
 0x1de   : > { %v993_v32 = vpop.f32.mrf.mxu0 }
 0x1e0   : > { %v1973_v33 = vpop.f32.mrf.mxu0 }
 0x1e2   : > { %v919_v34 = vpop.f32.mrf.mxu1  ;;  %v1141_v35 = vpop.f32.mrf.mxu0 }
 0x1e3   : > { %v920_v36 = vadd.f32 %v919_v34, %v843_v30 }
 0x1e4   : > { %v1968_v37 = vpop.f32.mrf.mxu1  ;;  %v1983_v38 = vpop.f32.mrf.mxu0 }
 0x1e5   : > { %v994_v39 = vadd.f32 %v993_v32, %v920_v36 }
 0x1e6   : > { %v1067_v40 = vpop.f32.mrf.mxu1 }
 0x1e7   : > { %v1068_v41 = vadd.f32 %v1067_v40, %v994_v39 }
 0x1e8   : > { %v1978_v42 = vpop.f32.mrf.mxu1 }
 0x1e9   : > { %v1142_v43 = vadd.f32 %v1141_v35, %v1068_v41 }
 0x1ea   : > { %v1213_v44 = vpop.f32.mrf.mxu1 }
 0x1eb   : > { %v1214_v45 = vadd.f32 %v1213_v44, %v1142_v43 }
 0x1ec   : > { %v1988_v46 = vpop.f32.mrf.mxu1 }
 0x1ed   : > { %v1218_v47 = vmul.f32 0.125, %v1214_v45 }
 0x1ef   : > { %v1220_v48 = vsel %vm1219_vm3, %v1218_v47, -inf }
 0x1f0   : > { %1221 = vmax.xlane.f32.xlu0 %v1220_v48 }
 0x279   : > { %v1222_v49 = vpop.xlane.xlu0 %1221 }
 0x27a   : > { %v1223_v50 = vsub.f32 %v1218_v47, %v1222_v49 }
 0x27c   : > { %v1224_v51 = vmul.f32 1.442695, %v1223_v50 }
 0x27e   : > { %2060 = vpow2.f32 %v1224_v51 }
 0x28b   : > { %v2061_v52 = vpop.eup %2060 }
 0x28c   : > { %v1226_v53 = vsel %vm1219_vm3, %v2061_v52, 0.0 }
 0x28d   : > { %1227 = vadd.xlane.f32.xlu0 %v1226_v53 }
 0x316   : > { %v1228_v54 = vpop.xlane.xlu0 %1227 }
 0x317   : > { %2062 = vrcp.f32 %v1228_v54 }
 0x324   : > { %v2063_v55 = vpop.eup %2062 }
 0x325   : > { %v1230_v56 = vmul.f32 %v2063_v55, %v2061_v52 }
 0x327   : > { %v1232_v57 = vsel %vm764_vm2, %v1230_v56, 0 }
 0x328   : > { %v1300_v58 = vand.u32 4294901760, %v1232_v57 }
 0x32a   : > { %v1301_v59 = vsub.f32 %v1232_v57, %v1300_v58  ;;  %1997 = vmatmul.mubr.f32.vlgmr.msra.gmra.mxu1 %v1300_v58 }
 0x32b   : > { %2005 = vmatpush3.msra.mxu1 %v2448_v22  ;;  %2006 = vmatprep.mubr.msk.f32.mxu1 %vm2127_vm0, %v2126_v3 }
 0x32c   : > { %2014 = vmatprep.subr.mxu1 %v2126_v3  ;;  %v1302_v60 = vand.u32 4294901760, %v1301_v59 }
 0x32e   : > { %2007 = vmatmul.mubr.f32.vlgmr.msra.gmra.mxu1 %v1302_v60  ;;  %v1303_v61 = vsub.f32 %v1301_v59, %v1302_v60 }
 0x32f   : > { %2015 = vmatpush3.msra.mxu1 %v2448_v22  ;;  %2016 = vmatprep.mubr.msk.f32.mxu1 %vm2127_vm0, %v2126_v3 }
 0x330   : > { %v1304_v62 = vand.u32 4294901760, %v1303_v61 }
 0x332   : > { %1992 = vmatmul.mubr.f32.vlgmr.msra.gmra.mxu0 %v1304_v62  ;;  %2017 = vmatmul.mubr.f32.vlgmr.msra.gmra.mxu1 %v1300_v58 }
 0x333   : > { %2000 = vmatpush3.msra.mxu0 %v2454_v25  ;;  %2001 = vmatprep.mubr.msk.f32.mxu0 %vm2127_vm0, %v2126_v3 }
 0x334   : > { %2009 = vmatprep.subr.mxu0 %v2126_v3 }
 0x336   : > { %2002 = vmatmul.mubr.f32.vlgmr.msra.gmra.mxu0 %v1301_v59 }
 0x337   : > { %2010 = vmatpush3.msra.mxu0 %v1343_v27  ;;  %2011 = vmatprep.mubr.msk.f32.mxu0 %vm2127_vm0, %v2126_v3 }
 0x33a   : > { %2012 = vmatmul.mubr.f32.vlgmr.msra.gmra.mxu0 %v1300_v58 }
 0x3ea   : > { %v1382_v63 = vpop.f32.mrf.mxu1 }
 0x3ec   : > { %v1998_v0 = vpop.f32.mrf.mxu1 }
 0x3ee   : > { %v1530_v1 = vpop.f32.mrf.mxu1 }
 0x3f0   : > { %v2008_v2 = vpop.f32.mrf.mxu1 }
 0x3f2   : > { %v1306_v4 = vpop.f32.mrf.mxu0  ;;  %v1676_v5 = vpop.f32.mrf.mxu1 }
 0x3f3   : > { %v1383_v8 = vadd.f32 %v1382_v63, %v1306_v4 }
 0x3f4   : > { %v1993_v6 = vpop.f32.mrf.mxu0  ;;  %v2018_v7 = vpop.f32.mrf.mxu1 }
 0x3f6   : > { %v1456_v9 = vpop.f32.mrf.mxu0 }
 0x3f7   : > { %v1457_v10 = vadd.f32 %v1456_v9, %v1383_v8 }
 0x3f8   : > { %v2003_v11 = vpop.f32.mrf.mxu0 }
 0x3f9   : > { %v1531_v12 = vadd.f32 %v1530_v1, %v1457_v10 }
 0x3fa   : > { %v1604_v13 = vpop.f32.mrf.mxu0 }
 0x3fb   : > { %v1605_v3 = vadd.f32 %v1604_v13, %v1531_v12 }
 0x3fc   : > { %v2013_v14 = vpop.f32.mrf.mxu0 }
 0x3fd   : > { %v1677_v15 = vadd.f32 %v1676_v5, %v1605_v3 }
 0x3ff   : > { %1680 = vst.msk [vmem:[%s198_s12] sm:$0x1] %vm1219_vm3, %v1677_v15 }
 0x400   : > { %2077 = shalt.err (!%p2074_p3)
}
 0x401   : > { %s2078_s30 = scalar_lea.hbm %s1692_s22, 16  ;;  %s2082_s7 = scalar_lea.hbm %s2534_s4, 32 }
 0x402   : > { %p2079_p4 = scmp.ne.s32.totalorder %s1692_s22, %s2078_s30  ;;  %p2083_p9 = scmp.lt.s32.totalorder %s1692_s22, %s2534_s4 }
 0x403   : > { %p2084_p10 = scmp.lt.s32.totalorder %s2082_s7, %s2078_s30 }
 0x404   : > { %p2080_p7 = pnand %p2079_p4, %p2192_p5 }
 0x405   : > { %p2085_p11 = por %p2084_p10, %p2083_p9 }
 0x406   : > { %p2081_p8 = pneg %p2080_p7 }
 0x408   : > { %p2086_p12 = pnand %p2085_p11, %p2081_p8 }
 0x40a   : > { %2089 = shalt.err (!%p2086_p12)
}
 0x40b   : > { %2019 = dma.vmem_to_hbm [thread:$0]  (%p2192_p5), %s1695_s13, 16, %s1692_s22, %s1682_s23  }
 0x40c PF: > { %p2025_p13 = scmp.ge.s32.totalorder %s2124_s18, 2  ;;  %s1706_s10 = sand.u32 1, %s2112_s15  }
 0x40d   : > { %s1707_s11 = scalar_lea.sflag [#allocation3], %s1706_s10 }
 0x40e   : > { %p2022_p0 = pnand %p2025_p13, %p2196_p6 }
 0x410   : > { %p2023_p1 = pneg %p2022_p0 }
 0x412   : > { %2107 = dma.done.wait (%p2023_p1), %s1707_s11, 16  }
 0x413   : > { %2109 = vsyncadd (%p2023_p1), %s1707_s11, 4294967280  ;;  %p14_p2 = scmp.ge.s32.totalorder %s2179_s21, 4   ;;  %s2537_s15 = smov %s2116_s16 }
 0x414   : > { %s2538_s16 = smov %s2120_s17  ;;  %s2539_s17 = smov %s2190_s24 }
 0x415   : > { %s2540_s18 = smov %s2179_s21  ;;  %16 = sbr.rel (!%p14_p2) target bundleno = 3 (0x3), region = 74 }
 0x41a   :  { %1711 = vsyncpa [#allocation3], 1 }
 0x41b   :  { %1713 = vsyncpa [#allocation3 + $0x1], 1 }

</bundles_post_ra>
